<compile_context>
chip_gen: v7x
topology: tpu7x:2x2x1
jax: 0.10.0
libtpu: 0.0.40
codegen_flags: <defaults>
</compile_context>

<pallas_src>
import jax
import jax.numpy as jnp
from jax.experimental import pallas as pl
from jax.experimental.pallas import tpu as pltpu

EPS = 1e-3  # matches nn.BatchNorm1d(out_channels, eps=0.001)


def basic_fc_bn_kernel(x_ref, w_ref, gamma_ref, beta_ref, o_ref):
    # Linear (bias intentionally omitted: training-mode BN subtracts the batch
    # mean, which cancels any per-feature bias exactly).
    y = jnp.dot(x_ref[...], w_ref[...], preferred_element_type=jnp.float32)  # (N, TN)

    # BatchNorm1d training-mode statistics over the batch axis.
    # Per-feature, so they are exact under Cout tiling. Biased variance.
    n = y.shape[0]
    inv_n = 1.0 / n
    mean = jnp.sum(y, axis=0, keepdims=True) * inv_n            # (1, TN)
    diff = y - mean
    var = jnp.sum(diff * diff, axis=0, keepdims=True) * inv_n   # (1, TN)
    inv_std = jax.lax.rsqrt(var + EPS)

    # Fold gamma / mean / inv_std into a single scale+shift -> one FMA + ReLU
    # per element of the (N, TN) slab.
    scale = gamma_ref[...] * inv_std                            # (1, TN)
    shift = beta_ref[...] - mean * scale                        # (1, TN)
    o_ref[...] = jnp.maximum(y * scale + shift, 0.0).astype(o_ref.dtype)


def _choose_tn(cout, cin, n, budget_bytes=24 * 1024 * 1024):
    """Pick a Cout tile: widest 256-/128-aligned divisor that fits the VMEM budget."""
    candidates = [t for t in (2048, 1024, 512, 256, 128) if cout % t == 0]
    for tn in candidates:
        # double-buffered W tile + double-buffered out tile + gamma/beta tiles (f32)
        tile_bytes = 4 * (2 * cin * tn + 2 * n * tn + 4 * tn)
        if tile_bytes <= budget_bytes:
            return tn
    if candidates:
        return candidates[-1]
    return cout  # full (possibly unaligned) width: block == full dim is allowed


def basic_fc_bn(x, weight, bias, gamma, beta, *, tn=None):
    """x: (N, Cin) f32; weight: (Cout, Cin) as in nn.Linear; bias/gamma/beta: (Cout,).

    `bias` is accepted for API parity with nn.Linear but is a mathematical no-op
    on the output of train-mode BatchNorm, so it is not sent to the kernel.
    """
    del bias
    n, cin = x.shape
    cout = weight.shape[0]
    w_t = weight.T                     # (Cin, Cout) so the kernel computes x @ W
    g2 = gamma.reshape(1, cout)
    be2 = beta.reshape(1, cout)

    if tn is None:
        tn = _choose_tn(cout, cin, n)
    assert cout % tn == 0, (cout, tn)
    grid = (cout // tn,)

    # VMEM budget: resident x + double-buffered W / out / gamma / beta tiles.
    footprint = 4 * (n * cin + 2 * cin * tn + 2 * n * tn + 4 * tn)
    vmem_limit = int(min(max(2 * footprint, 32 * 1024 * 1024), 100 * 1024 * 1024))

    # TODO(synk): add an inner K ("arbitrary") grid axis with a VMEM accumulator
    # (P3 pattern) if Cin ever grows too large to keep x and a (Cin, TN) W tile
    # resident; the demo/typical Cin fits comfortably.
    return pl.pallas_call(
        basic_fc_bn_kernel,
        out_shape=jax.ShapeDtypeStruct((n, cout), x.dtype),
        grid=grid,
        in_specs=[
            pl.BlockSpec((n, cin), lambda j: (0, 0)),    # x: resident across Cout tiles
            pl.BlockSpec((cin, tn), lambda j: (0, j)),   # W tile, streamed/pipelined
            pl.BlockSpec((1, tn), lambda j: (0, j)),     # gamma tile
            pl.BlockSpec((1, tn), lambda j: (0, j)),     # beta tile
        ],
        out_specs=pl.BlockSpec((n, tn), lambda j: (0, j)),
        compiler_params=pltpu.CompilerParams(
            dimension_semantics=("parallel",),           # shard Cout tiles across TCs (v7x)
            vmem_limit_bytes=vmem_limit,
        ),
    )(x, w_t, g2, be2)


def reference(x, weight, bias, gamma, beta):
    # Full PyTorch forward semantics, *including* the Linear bias, to verify
    # that dropping it in the kernel is output-preserving.
    y = x @ weight.T + bias
    mean = y.mean(axis=0, keepdims=True)
    var = ((y - mean) ** 2).mean(axis=0, keepdims=True)   # biased, as PyTorch BN forward
    y_hat = (y - mean) / jnp.sqrt(var + EPS)
    return jnp.maximum(gamma * y_hat + beta, 0.0)


if __name__ == "__main__":
    key = jax.random.PRNGKey(0)
    k_x, k_w, k_b, k_g, k_be = jax.random.split(key, 5)

    N, CIN, COUT = 8, 32, 128
    x = jax.random.normal(k_x, (N, CIN), dtype=jnp.float32)
    # Deterministic synthetic parameters (mimic nn.Linear uniform init loosely).
    weight = jax.random.uniform(k_w, (COUT, CIN), minval=-0.1, maxval=0.1, dtype=jnp.float32)
    bias = jax.random.uniform(k_b, (COUT,), minval=-0.1, maxval=0.1, dtype=jnp.float32)
    gamma = 1.0 + 0.05 * jax.random.normal(k_g, (COUT,), dtype=jnp.float32)
    beta = 0.05 * jax.random.normal(k_be, (COUT,), dtype=jnp.float32)

    out = basic_fc_bn(x, weight, bias, gamma, beta)
    out = jax.block_until_ready(out)

    ref = reference(x, weight, bias, gamma, beta)
    assert out.shape == (N, COUT)
    err = float(jnp.max(jnp.abs(out - ref)))
    assert jnp.allclose(out, ref, atol=2e-4, rtol=2e-4), err
    print("KERNEL_OK")
</pallas_src>

<mosaic_0001>
module attributes {stable_mosaic.version = 11 : i64} {
  func.func @basic_fc_bn_kernel(%arg0: i32, %arg1: memref<8x32xf32, #tpu.memory_space<vmem>>, %arg2: memref<32x128xf32, #tpu.memory_space<vmem>>, %arg3: memref<1x128xf32, #tpu.memory_space<vmem>>, %arg4: memref<1x128xf32, #tpu.memory_space<vmem>>, %arg5: memref<8x128xf32, #tpu.memory_space<vmem>>) attributes {dimension_semantics = [#tpu.dimension_semantics<parallel>], iteration_bounds = array<i64: 1>, scalar_prefetch = 0 : i64, scratch_operands = 0 : i64, tpu.core_type = #tpu.core_type<tc>, window_params = [{pipeline_mode = #tpu.pipeline_mode<synchronous>, transform_indices = @transform_0, window_bounds = array<i64: 8, 32>}, {transform_indices = @transform_1, window_bounds = array<i64: 32, 128>}, {transform_indices = @transform_2, window_bounds = array<i64: 1, 128>}, {transform_indices = @transform_3, window_bounds = array<i64: 1, 128>}, {transform_indices = @transform_4, window_bounds = array<i64: 8, 128>}]} {
    %c0 = arith.constant 0 : index
    %c0_0 = arith.constant 0 : index
    %0 = vector.load %arg1[%c0, %c0_0] : memref<8x32xf32, #tpu.memory_space<vmem>>, vector<8x32xf32>
    %c0_1 = arith.constant 0 : index
    %c0_2 = arith.constant 0 : index
    %1 = vector.load %arg2[%c0_1, %c0_2] : memref<32x128xf32, #tpu.memory_space<vmem>>, vector<32x128xf32>
    %cst = arith.constant dense<0.000000e+00> : vector<8x128xf32>
    %2 = tpu.matmul %0, %1, %cst {dimension_numbers = #tpu.dot_dimension_numbers<[1], [0], [0], [1], [0, 0, 1, 1], [], []>} : vector<8x32xf32>, vector<32x128xf32>, vector<8x128xf32> -> vector<8x128xf32>
    %cst_3 = arith.constant dense<0.000000e+00> : vector<128xf32>
    %3 = vector.multi_reduction <add>, %2, %cst_3 [0] : vector<8x128xf32> to vector<128xf32>
    %4 = vector.shape_cast %3 : vector<128xf32> to vector<1x128xf32>
    %cst_4 = arith.constant 1.250000e-01 : f32
    %5 = vector.broadcast %cst_4 : f32 to vector<1x128xf32>
    %6 = arith.mulf %4, %5 : vector<1x128xf32>
    %7 = vector.broadcast %6 : vector<1x128xf32> to vector<8x128xf32>
    %8 = arith.subf %2, %7 : vector<8x128xf32>
    %9 = arith.mulf %8, %8 : vector<8x128xf32>
    %cst_5 = arith.constant dense<0.000000e+00> : vector<128xf32>
    %10 = vector.multi_reduction <add>, %9, %cst_5 [0] : vector<8x128xf32> to vector<128xf32>
    %11 = vector.shape_cast %10 : vector<128xf32> to vector<1x128xf32>
    %cst_6 = arith.constant 1.250000e-01 : f32
    %12 = vector.broadcast %cst_6 : f32 to vector<1x128xf32>
    %13 = arith.mulf %11, %12 : vector<1x128xf32>
    %cst_7 = arith.constant 1.000000e-03 : f32
    %14 = vector.broadcast %cst_7 : f32 to vector<1x128xf32>
    %15 = arith.addf %13, %14 : vector<1x128xf32>
    %16 = math.rsqrt %15 : vector<1x128xf32>
    %c0_8 = arith.constant 0 : index
    %c0_9 = arith.constant 0 : index
    %17 = vector.load %arg3[%c0_8, %c0_9] : memref<1x128xf32, #tpu.memory_space<vmem>>, vector<1x128xf32>
    %18 = arith.mulf %17, %16 : vector<1x128xf32>
    %c0_10 = arith.constant 0 : index
    %c0_11 = arith.constant 0 : index
    %19 = vector.load %arg4[%c0_10, %c0_11] : memref<1x128xf32, #tpu.memory_space<vmem>>, vector<1x128xf32>
    %20 = arith.mulf %6, %18 : vector<1x128xf32>
    %21 = arith.subf %19, %20 : vector<1x128xf32>
    %22 = vector.broadcast %18 : vector<1x128xf32> to vector<8x128xf32>
    %23 = arith.mulf %2, %22 : vector<8x128xf32>
    %24 = vector.broadcast %21 : vector<1x128xf32> to vector<8x128xf32>
    %25 = arith.addf %23, %24 : vector<8x128xf32>
    %cst_12 = arith.constant 0.000000e+00 : f32
    %26 = vector.broadcast %cst_12 : f32 to vector<8x128xf32>
    %27 = arith.maximumf %25, %26 : vector<8x128xf32>
    %c0_13 = arith.constant 0 : index
    %c0_14 = arith.constant 0 : index
    %28 = vector.load %arg5[%c0_13, %c0_14] : memref<8x128xf32, #tpu.memory_space<vmem>>, vector<8x128xf32>
    tpu.vector_store %arg5[%c0_13, %c0_14], %27 {strides = array<i32>} : memref<8x128xf32, #tpu.memory_space<vmem>>, vector<8x128xf32>,
    return
  }
  func.func @transform_0(%arg0: i32) -> (i32, i32) {
    %c0_i32 = arith.constant 0 : i32
    %c0_i32_0 = arith.constant 0 : i32
    %c0_i32_1 = arith.constant 0 : i32
    return %c0_i32, %c0_i32_0 : i32, i32
  }
  func.func @transform_1(%arg0: i32) -> (i32, i32) {
    %c0_i32 = arith.constant 0 : i32
    %c0_i32_0 = arith.constant 0 : i32
    return %c0_i32, %arg0 : i32, i32
  }
  func.func @transform_2(%arg0: i32) -> (i32, i32) {
    %c0_i32 = arith.constant 0 : i32
    %c0_i32_0 = arith.constant 0 : i32
    return %c0_i32, %arg0 : i32, i32
  }
  func.func @transform_3(%arg0: i32) -> (i32, i32) {
    %c0_i32 = arith.constant 0 : i32
    %c0_i32_0 = arith.constant 0 : i32
    return %c0_i32, %arg0 : i32, i32
  }
  func.func @transform_4(%arg0: i32) -> (i32, i32) {
    %c0_i32 = arith.constant 0 : i32
    %c0_i32_0 = arith.constant 0 : i32
    return %c0_i32, %arg0 : i32, i32
  }
}

</mosaic_0001>

<bundles_post_ra>
// kernel: tpu_custom_call.1
= control target key start
LH: loop header
LB: loop body
LE: loop exit
PB: predicated region body
PF: predicated region fallthrough
CT: control target
= control target key end

     0   :  { %9 = vsyncpa [#allocation3], 0  ;;  %s365_s0 = inlined_call_operand.hbm [shape: f32[8,32], index: 0, kind: input, shape index: {}]   ;;  %s366_s1 = inlined_call_operand.hbm [shape: f32[32,128], index: 1, kind: input, shape index: {}]   ;;  %s367_s2 = inlined_call_operand.vmem [shape: f32[1,128], index: 2, kind: input, shape index: {}]   ;;  %s368_s3 = inlined_call_operand.vmem [shape: f32[1,128], index: 3, kind: input, shape index: {}]   ;;  %s369_s4 = inlined_call_operand.hbm [shape: f32[8,128], index: 4, kind: output, shape index: {}]  }
   0x1   :  { %10 = vsyncpa [#allocation6], 0 }
   0x2   :  { %11 = vsyncpa [#allocation4], 0  ;;  %s283_s15 = smov [#allocation2]   ;;  %s284_s17 = smov [#allocation5]  }
   0x3   :  { %s18_s16 = sshll.u32 %s283_s15, 4  ;;  %s27_s18 = sshll.u32 %s284_s17, 4  ;;  %s19_s16 = int_to_ptr.vmem [resolvable:$true] %s18_s16  ;;  %s316_s18 = int_to_ptr.vmem [resolvable:$true] %s27_s18 }
   0x4   :  { %s211_s21 = scalar_lea.hbm %s365_s0, 128 }
   0x5   :  { %p212_p0 = scmp.ne.s32.totalorder %s365_s0, %s211_s21  ;;  %p215_p1 = scmp.lt.u32.totalorder %s211_s21, %s365_s0 }
   0x7   :  { %p217_p2 = pnand %p215_p1, %p212_p0 }
   0x9   :  { %220 = shalt.err (!%p217_p2)
}
   0xa   :  { %s221_s26 = scalar_lea.vmem %s19_s16, 128  ;;  %p226_p4 = scmp.lt.s32.totalorder %s19_s16, %s19_s16 }
   0xb   :  { %p222_p3 = scmp.ne.s32.totalorder %s19_s16, %s221_s26  ;;  %p227_p5 = scmp.lt.s32.totalorder %s221_s26, %s221_s26 }
   0xd   :  { %p228_p6 = por %p227_p5, %p226_p4 }
   0xf   :  { %p229_p7 = pnand %p228_p6, %p222_p3 }
  0x11   :  { %232 = shalt.err (!%p229_p7)
}
  0x12   :  { %21 = dma.hbm_to_vmem [thread:$0]  %s365_s0, 128, %s19_s16, [#allocation3]  }
  0x13   :  { %s233_s5 = scalar_lea.hbm %s366_s1, 512 }
  0x14   :  { %p234_p8 = scmp.ne.s32.totalorder %s366_s1, %s233_s5  ;;  %p237_p9 = scmp.lt.u32.totalorder %s233_s5, %s366_s1 }
  0x16   :  { %p239_p10 = pnand %p237_p9, %p234_p8 }
  0x18   :  { %242 = shalt.err (!%p239_p10)
}
  0x19   :  { %s243_s10 = scalar_lea.vmem %s316_s18, 512  ;;  %p248_p12 = scmp.lt.s32.totalorder %s316_s18, %s316_s18 }
  0x1a   :  { %p244_p11 = scmp.ne.s32.totalorder %s316_s18, %s243_s10  ;;  %p249_p13 = scmp.lt.s32.totalorder %s243_s10, %s243_s10 }
  0x1c   :  { %p250_p0 = por %p249_p13, %p248_p12 }
  0x1e   :  { %p251_p1 = pnand %p250_p0, %p244_p11 }
  0x20   :  { %254 = shalt.err (!%p251_p1)
}
  0x21   :  { %s285_s0 = smov 128   ;;  %s286_s11 = smov 8  }
  0x22   :  { %33 = dma.hbm_to_vmem [thread:$0]  %s366_s1, 512, %s316_s18, [#allocation6], %s285_s0, %s285_s0, %s286_s11  }
  0x23   :  { %277 = dma.done.wait [#allocation3], 128  }
  0x24   :  { %278 = vsyncadd [#allocation3], 4294967168 }
  0x25   :  { %279 = dma.done.wait [#allocation6], 512  }
  0x26   :  { %280 = vsyncadd [#allocation6], 4294966784  ;;  %v287_v0 = vmov 0.0|0.0   ;;  %vm288_vm0 = vmmov 0   ;;  %v289_v1 = vmov 0.0   ;;  %v45_v2 = vld [vmem:[#allocation5] sm:$0xff]  ;;  %v147_v28 = vlaneseq }
  0x27   :  { %195 = vmatprep.subr.bf16.mxu0 %v287_v0  ;;  %192 = vmatprep.mubr.msk.f32.mxu0 %vm288_vm0, %v289_v1  ;;  %v46_v3 = vld [vmem:[#allocation5 + $0x8] sm:$0xff]  ;;  %v47_v4 = vld [vmem:[#allocation5 + $0x10] sm:$0xff]  ;;  %v48_v6 = vld [vmem:[#allocation5 + $0x18] sm:$0xff]  ;;  %vm49_vm1 = vcmask 261120   ;;  %s290_s17 = smov [#allocation7]  }
  0x28   :  { %v196_v5 = vpack.c.bf16 %v46_v3, %v45_v2  ;;  %v199_v7 = vpack.c.bf16 %v48_v6, %v47_v4  ;;  %v44_v8 = vld [vmem:[#allocation2] sm:$0xff]  ;;  %v148_v29 = vshrl.u32 %v147_v28, 7  ;;  %s168_s18 = sshll.u32 %s290_s17, 4  ;;  %s169_s18 = int_to_ptr.vmem [resolvable:$true] %s168_s18 }
  0x29   :  { %v141_v30 = vld [vmem:[%s367_s2] sm:$0x1]  ;;  %s255_s19 = scalar_lea.vmem %s169_s18, 128  ;;  %p260_p3 = scmp.lt.s32.totalorder %s169_s18, %s169_s18 }
  0x2a   :  { %197 = vmatpush3.bf16.msra.mxu0 %v196_v5  ;;  %v149_v31 = vsub.s32 0, %v148_v29  ;;  %v143_v34 = vld [vmem:[%s368_s3] sm:$0x1]  ;;  %p256_p2 = scmp.ne.s32.totalorder %s169_s18, %s255_s19  ;;  %p261_p4 = scmp.lt.s32.totalorder %s255_s19, %s255_s19 }
  0x2b   :  { %198 = vmatprep.subr.bf16.mxu0 %v287_v0 }
  0x2c   :  { %p262_p5 = por %p261_p4, %p260_p3 }
  0x2e   :  { %200 = vmatpush3.bf16.msra.mxu0 %v199_v7  ;;  %p263_p6 = pnand %p262_p5, %p256_p2 }
  0x31   :  { %193 = vmatmul.mubr.msk.f32.vlgmr.msra.gmra.mrb[0].mxu0 %vm49_vm1, %v44_v8 }
 0x104   :  { %v119_v9 = vpop.f32.mrb[0].mxu0 }
 0x105   :  { %v123_v10 = vrot.slane %v119_v9, 4  ;;  %v194_v11 = vpop.f32.mrb[1].mxu0 }
 0x107   :  { %v124_v12 = vadd.f32 %v123_v10, %v119_v9 }
 0x109   :  { %v125_v13 = vrot.slane %v124_v12, 2 }
 0x10b   :  { %v126_v14 = vadd.f32 %v125_v13, %v124_v12 }
 0x10d   :  { %v127_v15 = vrot.slane %v126_v14, 1 }
 0x10f   :  { %v128_v16 = vadd.f32 %v127_v15, %v126_v14 }
 0x111   :  { %v129_v17 = vmul.f32 0.125, %v128_v16 }
 0x113   :  { %v130_v18 = vsub.f32 %v119_v9, %v129_v17 }
 0x115   :  { %v131_v19 = vmul.f32 %v130_v18, %v130_v18 }
 0x117   :  { %v132_v20 = vrot.slane %v131_v19, 4 }
 0x119   :  { %v133_v21 = vadd.f32 %v132_v20, %v131_v19 }
 0x11b   :  { %v134_v22 = vrot.slane %v133_v21, 2 }
 0x11d   :  { %v135_v23 = vadd.f32 %v134_v22, %v133_v21 }
 0x11f   :  { %v136_v24 = vrot.slane %v135_v23, 1 }
 0x121   :  { %v137_v25 = vadd.f32 %v136_v24, %v135_v23 }
 0x123   :  { %v138_v26 = vmul.f32 0.125, %v137_v25 }
 0x125   :  { %v139_v27 = vadd.f32 0.001, %v138_v26 }
 0x127   :  { %209 = vrsqrt.f32 %v139_v27 }
 0x131   :  { %v210_v32 = vpop.eup %209 }
 0x132   :  { %v142_v33 = vmul.f32 %v210_v32, %v141_v30 }
 0x134   :  { %v144_v35 = vmul.f32 %v142_v33, %v129_v17  ;;  %v150_v36 = vrot.slane %v142_v33, %v149_v31 }
 0x136   :  { %v145_v37 = vsub.f32 %v143_v34, %v144_v35  ;;  %v152_v38 = vmul.f32 %v150_v36, %v119_v9 }
 0x138   :  { %v157_v39 = vrot.slane %v145_v37, %v149_v31 }
 0x13a   :  { %v159_v40 = vadd.f32 %v157_v39, %v152_v38 }
 0x13c   :  { %v160_v41 = vmax.f32 %v159_v40, 0.0 }
 0x13e   :  { %161 = vst [vmem:[#allocation7] sm:$0xff] %v160_v41 }
 0x13f   :  { %266 = shalt.err (!%p263_p6)
}
 0x140   :  { %s267_s20 = scalar_lea.hbm %s369_s4, 128 }
 0x141   :  { %p268_p7 = scmp.ne.s32.totalorder %s369_s4, %s267_s20  ;;  %p271_p8 = scmp.lt.u32.totalorder %s267_s20, %s369_s4 }
 0x143   :  { %p273_p9 = pnand %p271_p8, %p268_p7 }
 0x145   :  { %276 = shalt.err (!%p273_p9)
}
 0x146   :  { %171 = dma.vmem_to_hbm [thread:$0]  %s169_s18, 128, %s369_s4, [#allocation4]  }
 0x147   :  { %281 = dma.done.wait [#allocation4], 128  }
 0x148   :  { %282 = vsyncadd [#allocation4], 4294967168 }
 0x149   :  { %175 = vsyncpa [#allocation3], 1 }
 0x14a   :  { %176 = vsyncpa [#allocation6], 1 }
 0x14b   :  { %177 = vsyncpa [#allocation4], 1 }

</bundles_post_ra>
